<compile_context>
chip_gen: v7x
topology: tpu7x:2x2x1
jax: 0.10.0
libtpu: 0.0.40
codegen_flags: <defaults>
</compile_context>

<pallas_src>
import functools

import jax
import jax.numpy as jnp
from jax.experimental import pallas as pl
from jax.experimental.pallas import tpu as pltpu


def _round_up(x, m):
    return ((x + m - 1) // m) * m


def _round_down(x, m):
    return max(m, (x // m) * m)


def _noisy_ce_kernel(logits_ref, tgt_ref, out_ref, m_sc, l_sc, *,
                     inv_temperature, p_noisy, min_weight, max_weight,
                     epoch_weight, batch, num_classes, tile_b, tile_c,
                     need_row_mask, need_col_mask):
    bi = pl.program_id(0)            # batch tile   ("parallel" -> megacore shard)
    ci = pl.program_id(1)            # class tile   ("arbitrary" -> online softmax)
    num_ci = pl.num_programs(1)

    # ---- init per-row online-softmax state on the first class tile ----------
    @pl.when(ci == 0)
    def _():
        m_sc[...] = jnp.full_like(m_sc, -jnp.inf)
        l_sc[...] = jnp.zeros_like(l_sc)

    # ---- load + temperature scale (HBM traffic stays in the input dtype) ----
    x = logits_ref[...].astype(jnp.float32)          # (tile_b, tile_c)
    if inv_temperature != 1.0:                       # static skip at T == 1
        x = x * jnp.float32(inv_temperature)

    def online_update(xt):
        m_prev = m_sc[...]
        m_new = jnp.maximum(m_prev, jnp.max(xt, axis=1, keepdims=True))
        alpha = jnp.exp(m_prev - m_new)
        p = jnp.exp(xt - m_new)
        l_sc[...] = alpha * l_sc[...] + jnp.sum(p, axis=1, keepdims=True)
        m_sc[...] = m_new

    if need_col_mask:
        # Only the last class tile is ragged; keep the mask (and the iota) off
        # the hot path.  The iota is a (1, tile_c) row broadcast in the compare,
        # not a full-tile materialization.
        @pl.when(ci == num_ci - 1)
        def _():
            col_row = ci * tile_c + jax.lax.broadcasted_iota(
                jnp.int32, (1, tile_c), 1)
            online_update(jnp.where(col_row < num_classes, x,
                                    jnp.float32(-1e30)))

        @pl.when(ci != num_ci - 1)
        def _():
            online_update(x)
    else:
        online_update(x)

    # ---- finalize on the last class tile: CE, confidence weights, partial sum
    @pl.when(ci == num_ci - 1)
    def _():
        l = l_sc[...]
        lse = m_sc[...] + jnp.log(l)                 # (tile_b, 1)
        losses = lse - tgt_ref[...]                  # CE, reduction='none'
        # max softmax prob == exp(max_logit - lse) == 1 / l; approx reciprocal
        # runs on the otherwise-idle EUP slot and only feeds a clipped weight.
        max_probs = pl.reciprocal(l, approx=True)
        base_w = (1.0 - p_noisy) + p_noisy * (1.0 - max_probs)
        if epoch_weight != 1.0:
            base_w = base_w * jnp.float32(epoch_weight)
        weights = jnp.clip(base_w, min_weight, max_weight)
        contrib = losses * weights
        if need_row_mask:
            # Padded rows may hold garbage/NaN; the select (not a multiply)
            # keeps them out of the partial sum.
            row_ids = bi * tile_b + jax.lax.broadcasted_iota(
                jnp.int32, (tile_b, 1), 0)
            contrib = jnp.where(row_ids < batch, contrib, 0.0)
        # lane-dense (1, 1, 128) store of this B-tile's partial weighted sum
        out_ref[...] = jnp.full(out_ref.shape, jnp.sum(contrib),
                                dtype=jnp.float32)


def enhanced_noisy_cross_entropy_loss(logits, targets, *,
                                      p_noisy=0.2, temperature=1.0,
                                      label_smoothing=0.1,  # accepted, unused (matches the torch forward)
                                      min_weight=0.1, max_weight=1.0,
                                      num_epochs=None, current_epoch=None,
                                      tile_b=None, tile_c=None):
    """JAX/Pallas equivalent of EnhancedNoisyCrossEntropyLoss.forward.

    logits : (B, C) float array (f32 or bf16), targets: (B,) int class indices.
    Returns a scalar float32 loss.
    """
    B, C = logits.shape
    itemsize = jnp.dtype(logits.dtype).itemsize
    inv_temperature = 1.0 / float(temperature)

    # ---- epoch weighting (static scalar) -------------------------------------
    if num_epochs is not None and current_epoch is not None:
        epoch_weight = 1.0 - (1.0 - float(p_noisy)) * (current_epoch / num_epochs)
    else:
        epoch_weight = 1.0

    # ---- hoisted target-logit gather (cheap XLA gather; removes the per-tile
    #      one-hot compare/select/sum and one scratch from the kernel) ---------
    # NOTE: out-of-range targets are clamped by the gather (torch would raise).
    tgt_idx = targets.astype(jnp.int32).reshape(B, 1)
    tgt_logits = jnp.take_along_axis(logits, tgt_idx, axis=1).astype(jnp.float32)
    if inv_temperature != 1.0:
        tgt_logits = tgt_logits * jnp.float32(inv_temperature)

    # ---- generation-aware VMEM budget -----------------------------------------
    try:
        vmem_capacity = int(pltpu.get_tpu_info().vmem_capacity_bytes)
    except Exception:
        vmem_capacity = 64 << 20              # conservative (v7x floor)
    if vmem_capacity >= (100 << 20):          # v5e / v6e: 128 MiB VMEM
        vmem_cap = 96 << 20
        elem_budget = (4 << 20) if itemsize < 4 else (3 << 20)
    else:                                     # v7x: 64 MiB VMEM (or unknown)
        vmem_cap = min(52 << 20, max(32 << 20, (vmem_capacity * 3) // 4))
        elem_budget = (2 << 20) if itemsize < 4 else (3 << 19)

    # ---- tile-size selection ---------------------------------------------------
    row_align = 16 if itemsize < 4 else 8     # bf16 packs 2 rows per sublane
    if tile_b is None:
        tile_b = min(512, B)
        if B > 2 * row_align:
            # keep >= 2 batch tiles so the "parallel" axis feeds both v7x TCs
            tile_b = min(tile_b, _round_up(pl.cdiv(B, 2), row_align))
    else:
        tile_b = min(int(tile_b), B)
    if B > tile_b:
        tile_b = max(row_align, (tile_b // row_align) * row_align)

    if tile_c is None:
        max_c = _round_down(elem_budget // tile_b, 128)
        tile_c = C if C <= max_c else max_c   # single C tile skips online-softmax chaining
    else:
        tile_c = C if C <= int(tile_c) else int(tile_c)
        if C > tile_c:
            tile_c = max(128, (tile_c // 128) * 128)

    num_b_tiles = pl.cdiv(B, tile_b)
    num_c_tiles = pl.cdiv(C, tile_c)
    need_row_mask = (B % tile_b) != 0
    need_col_mask = (C % tile_c) != 0

    kernel = functools.partial(
        _noisy_ce_kernel,
        inv_temperature=inv_temperature,
        p_noisy=float(p_noisy),
        min_weight=float(min_weight),
        max_weight=float(max_weight),
        epoch_weight=float(epoch_weight),
        batch=B, num_classes=C, tile_b=tile_b, tile_c=tile_c,
        need_row_mask=need_row_mask, need_col_mask=need_col_mask,
    )

    # ---- VMEM budget: logits double-buffer + f32 temporaries of the cast/exp
    #      chain + lane-padded (tile_b, 1) blocks + fixed headroom --------------
    f32_tile = tile_b * tile_c * 4
    lane_padded_col = tile_b * 128 * 4        # (tile_b, 1) blocks pad lanes to 128
    needed = (2 * tile_b * tile_c * itemsize  # double-buffered logits tiles
              + 3 * f32_tile                  # cast / exp / p temporaries
              + 2 * lane_padded_col           # double-buffered target-logit blocks
              + 2 * lane_padded_col           # m / l online-softmax scratch
              + 2 * 128 * 4)                  # output partial blocks
    vmem_limit = int(min(max(needed + (8 << 20), 32 << 20), vmem_cap))

    cost = pl.CostEstimate(
        flops=5 * B * C,
        transcendentals=B * C,
        bytes_accessed=B * C * itemsize + B * 4 + num_b_tiles * 128 * 4,
    )

    partials = pl.pallas_call(
        kernel,
        out_shape=jax.ShapeDtypeStruct((num_b_tiles, 1, 128), jnp.float32),
        grid_spec=pltpu.PrefetchScalarGridSpec(
            num_scalar_prefetch=0,
            grid=(num_b_tiles, num_c_tiles),
            in_specs=[
                pl.BlockSpec((tile_b, tile_c), lambda bi, ci: (bi, ci)),
                pl.BlockSpec((tile_b, 1), lambda bi, ci: (bi, 0)),
            ],
            out_specs=pl.BlockSpec((1, 1, 128), lambda bi, ci: (bi, 0, 0)),
            scratch_shapes=[pltpu.VMEM((tile_b, 1), jnp.float32),
                            pltpu.VMEM((tile_b, 1), jnp.float32)],
        ),
        compiler_params=pltpu.CompilerParams(
            dimension_semantics=("parallel", "arbitrary"),
            vmem_limit_bytes=vmem_limit,
        ),
        cost_estimate=cost,
    )(logits, tgt_logits)

    # Per-B-tile partial weighted sums -> weighted mean over the true batch size.
    return jnp.sum(partials[:, 0, 0]) / jnp.float32(B)


if __name__ == "__main__":
    key = jax.random.PRNGKey(0)
    k1, k2, k3, k4 = jax.random.split(key, 4)

    def reference(logits, targets, *, p=0.2, temperature=1.0,
                  min_w=0.1, max_w=1.0, epoch_weight=1.0):
        b = logits.shape[0]
        scaled = logits / temperature
        lse = jax.scipy.special.logsumexp(scaled, axis=1)
        ce = lse - scaled[jnp.arange(b), targets]
        max_probs = jax.nn.softmax(scaled, axis=1).max(axis=1)
        base_w = (1.0 - p + p * (1.0 - max_probs)) * epoch_weight
        w = jnp.clip(base_w, min_w, max_w)
        return jnp.mean(ce * w)

    # 1) Small classification-style case (single tile).
    B, C = 8, 16
    logits = jax.random.normal(k1, (B, C), dtype=jnp.float32)
    targets = jax.random.randint(k2, (B,), 0, C, dtype=jnp.int32)
    loss = enhanced_noisy_cross_entropy_loss(logits, targets)
    jax.block_until_ready(loss)
    ref = reference(logits, targets)
    assert jnp.allclose(loss, ref, rtol=1e-3, atol=1e-3), (loss, ref)

    # 2) Exercise the tiled / ragged / online-softmax path
    #    (+ temperature + epoch weight + explicit tile override).
    B2, C2 = 36, 300
    logits2 = jax.random.normal(k3, (B2, C2), dtype=jnp.float32)
    targets2 = jax.random.randint(k4, (B2,), 0, C2, dtype=jnp.int32)
    loss2 = enhanced_noisy_cross_entropy_loss(
        logits2, targets2, temperature=2.0,
        num_epochs=10, current_epoch=3, tile_b=16, tile_c=128)
    jax.block_until_ready(loss2)
    ew = 1.0 - (1.0 - 0.2) * (3 / 10)
    ref2 = reference(logits2, targets2, temperature=2.0, epoch_weight=ew)
    assert jnp.allclose(loss2, ref2, rtol=1e-3, atol=1e-3), (loss2, ref2)

    print("KERNEL_OK")
</pallas_src>

<mosaic_0001>
module attributes {stable_mosaic.version = 11 : i64} {
  func.func @_noisy_ce_kernel(%arg0: i32, %arg1: i32, %arg2: memref<8x16xf32, #tpu.memory_space<vmem>>, %arg3: memref<8x1xf32, #tpu.memory_space<vmem>>, %arg4: memref<1x1x128xf32, #tpu.memory_space<vmem>>, %arg5: memref<8x1xf32, #tpu.memory_space<vmem>>, %arg6: memref<8x1xf32, #tpu.memory_space<vmem>>) attributes {dimension_semantics = [#tpu.dimension_semantics<parallel>, #tpu.dimension_semantics<arbitrary>], iteration_bounds = array<i64: 1, 1>, scalar_prefetch = 0 : i64, scratch_operands = 2 : i64, tpu.core_type = #tpu.core_type<tc>, window_params = [{transform_indices = @transform_0, window_bounds = array<i64: 8, 16>}, {transform_indices = @transform_1, window_bounds = array<i64: 8, 1>}, {transform_indices = @transform_2, window_bounds = array<i64: 1, 1, 128>}]} {
    %c0_i32 = arith.constant 0 : i32
    %0 = arith.cmpi eq, %arg1, %c0_i32 : i32
    %1 = arith.extui %0 : i1 to i32
    %c0_i32_0 = arith.constant 0 : i32
    %2 = arith.cmpi ne, %1, %c0_i32_0 : i32
    scf.if %2 {
      %cst_13 = arith.constant 0xFF800000 : f32
      %23 = vector.broadcast %cst_13 : f32 to vector<8x1xf32>
      %c0_14 = arith.constant 0 : index
      %c0_15 = arith.constant 0 : index
      %24 = vector.load %arg5[%c0_14, %c0_15] : memref<8x1xf32, #tpu.memory_space<vmem>>, vector<8x1xf32>
      tpu.vector_store %arg5[%c0_14, %c0_15], %23 {strides = array<i32>} : memref<8x1xf32, #tpu.memory_space<vmem>>, vector<8x1xf32>,
      %cst_16 = arith.constant 0.000000e+00 : f32
      %25 = vector.broadcast %cst_16 : f32 to vector<8x1xf32>
      %c0_17 = arith.constant 0 : index
      %c0_18 = arith.constant 0 : index
      %26 = vector.load %arg6[%c0_17, %c0_18] : memref<8x1xf32, #tpu.memory_space<vmem>>, vector<8x1xf32>
      tpu.vector_store %arg6[%c0_17, %c0_18], %25 {strides = array<i32>} : memref<8x1xf32, #tpu.memory_space<vmem>>, vector<8x1xf32>,
    } else {
    }
    %c0 = arith.constant 0 : index
    %c0_1 = arith.constant 0 : index
    %3 = vector.load %arg2[%c0, %c0_1] : memref<8x16xf32, #tpu.memory_space<vmem>>, vector<8x16xf32>
    %c0_2 = arith.constant 0 : index
    %c0_3 = arith.constant 0 : index
    %4 = vector.load %arg5[%c0_2, %c0_3] : memref<8x1xf32, #tpu.memory_space<vmem>>, vector<8x1xf32>
    %cst = arith.constant dense<0xFF800000> : vector<8xf32>
    %5 = vector.multi_reduction <maximumf>, %3, %cst [1] : vector<8x16xf32> to vector<8xf32>
    %6 = vector.shape_cast %5 : vector<8xf32> to vector<8x1xf32>
    %7 = arith.maximumf %4, %6 : vector<8x1xf32>
    %8 = arith.subf %4, %7 : vector<8x1xf32>
    %9 = math.exp %8 : vector<8x1xf32>
    %10 = vector.broadcast %7 : vector<8x1xf32> to vector<8x16xf32>
    %11 = arith.subf %3, %10 : vector<8x16xf32>
    %12 = math.exp %11 : vector<8x16xf32>
    %c0_4 = arith.constant 0 : index
    %c0_5 = arith.constant 0 : index
    %13 = vector.load %arg6[%c0_4, %c0_5] : memref<8x1xf32, #tpu.memory_space<vmem>>, vector<8x1xf32>
    %14 = arith.mulf %9, %13 : vector<8x1xf32>
    %cst_6 = arith.constant dense<0.000000e+00> : vector<8xf32>
    %15 = vector.multi_reduction <add>, %12, %cst_6 [1] : vector<8x16xf32> to vector<8xf32>
    %16 = vector.shape_cast %15 : vector<8xf32> to vector<8x1xf32>
    %17 = arith.addf %14, %16 : vector<8x1xf32>
    %c0_7 = arith.constant 0 : index
    %c0_8 = arith.constant 0 : index
    %18 = vector.load %arg6[%c0_7, %c0_8] : memref<8x1xf32, #tpu.memory_space<vmem>>, vector<8x1xf32>
    tpu.vector_store %arg6[%c0_7, %c0_8], %17 {strides = array<i32>} : memref<8x1xf32, #tpu.memory_space<vmem>>, vector<8x1xf32>,
    %c0_9 = arith.constant 0 : index
    %c0_10 = arith.constant 0 : index
    %19 = vector.load %arg5[%c0_9, %c0_10] : memref<8x1xf32, #tpu.memory_space<vmem>>, vector<8x1xf32>
    tpu.vector_store %arg5[%c0_9, %c0_10], %7 {strides = array<i32>} : memref<8x1xf32, #tpu.memory_space<vmem>>, vector<8x1xf32>,
    %c0_i32_11 = arith.constant 0 : i32
    %20 = arith.cmpi eq, %arg1, %c0_i32_11 : i32
    %21 = arith.extui %20 : i1 to i32
    %c0_i32_12 = arith.constant 0 : i32
    %22 = arith.cmpi ne, %21, %c0_i32_12 : i32
    scf.if %22 {
      %c0_13 = arith.constant 0 : index
      %c0_14 = arith.constant 0 : index
      %23 = vector.load %arg6[%c0_13, %c0_14] : memref<8x1xf32, #tpu.memory_space<vmem>>, vector<8x1xf32>
      %c0_15 = arith.constant 0 : index
      %c0_16 = arith.constant 0 : index
      %24 = vector.load %arg5[%c0_15, %c0_16] : memref<8x1xf32, #tpu.memory_space<vmem>>, vector<8x1xf32>
      %25 = math.log %23 : vector<8x1xf32>
      %26 = arith.addf %24, %25 : vector<8x1xf32>
      %c0_17 = arith.constant 0 : index
      %c0_18 = arith.constant 0 : index
      %27 = vector.load %arg3[%c0_17, %c0_18] : memref<8x1xf32, #tpu.memory_space<vmem>>, vector<8x1xf32>
      %28 = arith.subf %26, %27 : vector<8x1xf32>
      %29 = tpu.reciprocal %23 {approx = true} : vector<8x1xf32> -> vector<8x1xf32>
      %cst_19 = arith.constant 1.000000e+00 : f32
      %30 = vector.broadcast %cst_19 : f32 to vector<8x1xf32>
      %31 = arith.subf %30, %29 : vector<8x1xf32>
      %cst_20 = arith.constant 2.000000e-01 : f32
      %32 = vector.broadcast %cst_20 : f32 to vector<8x1xf32>
      %33 = arith.mulf %32, %31 : vector<8x1xf32>
      %cst_21 = arith.constant 8.000000e-01 : f32
      %34 = vector.broadcast %cst_21 : f32 to vector<8x1xf32>
      %35 = arith.addf %34, %33 : vector<8x1xf32>
      %cst_22 = arith.constant 1.000000e-01 : f32
      %cst_23 = arith.constant 1.000000e+00 : f32
      %36 = vector.broadcast %cst_22 : f32 to vector<8x1xf32>
      %37 = arith.maximumf %36, %35 : vector<8x1xf32>
      %38 = vector.broadcast %cst_23 : f32 to vector<8x1xf32>
      %39 = arith.minimumf %38, %37 : vector<8x1xf32>
      %40 = arith.mulf %28, %39 : vector<8x1xf32>
      %41 = vector.shape_cast %40 : vector<8x1xf32> to vector<1x8x1xf32>
      %cst_24 = arith.constant dense<0.000000e+00> : vector<1xf32>
      %42 = vector.multi_reduction <add>, %41, %cst_24 [1, 2] : vector<1x8x1xf32> to vector<1xf32>
      %43 = vector.shape_cast %42 : vector<1xf32> to vector<1x1x1xf32>
      %44 = vector.extract %43[0, 0, 0] : f32 from vector<1x1x1xf32>
      %45 = vector.broadcast %44 : f32 to vector<1x1x128xf32>
      %c0_25 = arith.constant 0 : index
      %c0_26 = arith.constant 0 : index
      %c0_27 = arith.constant 0 : index
      %46 = vector.load %arg4[%c0_25, %c0_26, %c0_27] : memref<1x1x128xf32, #tpu.memory_space<vmem>>, vector<1x1x128xf32>
      tpu.vector_store %arg4[%c0_25, %c0_26, %c0_27], %45 {strides = array<i32>} : memref<1x1x128xf32, #tpu.memory_space<vmem>>, vector<1x1x128xf32>,
    } else {
    }
    return
  }
  func.func @transform_0(%arg0: i32, %arg1: i32) -> (i32, i32) {
    %c0_i32 = arith.constant 0 : i32
    return %arg0, %arg1 : i32, i32
  }
  func.func @transform_1(%arg0: i32, %arg1: i32) -> (i32, i32) {
    %c0_i32 = arith.constant 0 : i32
    %c0_i32_0 = arith.constant 0 : i32
    return %arg0, %c0_i32 : i32, i32
  }
  func.func @transform_2(%arg0: i32, %arg1: i32) -> (i32, i32, i32) {
    %c0_i32 = arith.constant 0 : i32
    %c0_i32_0 = arith.constant 0 : i32
    %c0_i32_1 = arith.constant 0 : i32
    return %arg0, %c0_i32, %c0_i32_0 : i32, i32, i32
  }
}

</mosaic_0001>

<bundles_post_ra>
// kernel: tpu_custom_call.1
= control target key start
LH: loop header
LB: loop body
LE: loop exit
PB: predicated region body
PF: predicated region fallthrough
CT: control target
= control target key end

     0   :  { %vm21_vm0 = vcmask 130048   ;;  %s172_s0 = inlined_call_operand.vmem [shape: f32[8,16], index: 0, kind: input, shape index: {}]   ;;  %s173_s1 = inlined_call_operand.vmem [shape: f32[8,1], index: 1, kind: input, shape index: {}]   ;;  %s174_s2 = inlined_call_operand.hbm [shape: f32[1,1,128], index: 2, kind: output, shape index: {}]  }
   0x1   :  { %v19_v0 = vld [vmem:[%s172_s0] sm:$0xff] }
   0x2   :  { %7 = vsyncpa [#allocation5], 0  ;;  %v22_v1 = vsel %vm21_vm0, %v19_v0, -inf  ;;  %vm16_vm1 = vcmask 7168   ;;  %v128_v2 = vmov -inf   ;;  %v129_v3 = vmov 0  }
   0x3   :  { %23 = vmax.xlane.f32.xlu0 %v22_v1  ;;  %17 = vst.msk [vmem:[#allocation2] sm:$0xff] %vm16_vm1, %v128_v2  ;;  %v130_v4 = vmov 0.0   ;;  %v54_v29 = vld [vmem:[%s173_s1] sm:$0xff]  ;;  %s131_s12 = smov [#allocation4]  }
   0x4   :  { %95 = vset.pattern.permute.xlu0 %v129_v3  ;;  %18 = vst.msk [vmem:[#allocation3] sm:$0xff] %vm16_vm1, %v130_v4  ;;  %s81_s13 = sshll.u32 %s131_s12, 4  ;;  %s82_s13 = int_to_ptr.vmem [resolvable:$true] %s81_s13 }
   0x5   :  { %s104_s1 = scalar_lea.vmem %s82_s13, 16  ;;  %s108_s15 = scalar_lea.vmem %s82_s13, 32 }
   0x6   :  { %p105_p0 = scmp.ne.s32.totalorder %s82_s13, %s104_s1  ;;  %p109_p1 = scmp.lt.s32.totalorder %s82_s13, %s82_s13 }
   0x7   :  { %p110_p2 = scmp.lt.s32.totalorder %s108_s15, %s104_s1 }
   0x9   :  { %p111_p3 = por %p110_p2, %p109_p1 }
   0xa   :  { %v20_v5 = vld [vmem:[#allocation2] sm:$0xff] }
   0xb   :  { %v37_v16 = vld [vmem:[#allocation3] sm:$0xff]  ;;  %p112_p4 = pnand %p111_p3, %p105_p0 }
  0x90   :  { %v24_v6 = vpop.xlane.xlu0 %23 }
  0x91   :  { %v25_v7 = vmax.f32 %v20_v5, %v24_v6 }
  0x93   :  { %v26_v8 = vsub.f32 %v20_v5, %v25_v7  ;;  %45 = vst.msk [vmem:[#allocation2] sm:$0xff] %vm16_vm1, %v25_v7  ;;  %31 = vperm.xlu0 %95, %v25_v7  }
  0x95   :  { %v27_v14 = vmul.f32 1.442695, %v26_v8 }
  0x9a   :  { %v50_v26 = vld [vmem:[#allocation2] sm:$0xff] }
 0x112   :  { %v32_v9 = vpop.permute.xlu0 %31 }
 0x113   :  { %v34_v10 = vsub.f32 %v19_v0, %v32_v9 }
 0x115   :  { %v35_v11 = vmul.f32 1.442695, %v34_v10 }
 0x117   :  { %96 = vpow2.f32 %v35_v11 }
 0x118   :  { %98 = vpow2.f32 %v27_v14 }
 0x121   :  { %v97_v12 = vpop.eup %96 }
 0x122   :  { %v39_v13 = vsel %vm21_vm0, %v97_v12, 0.0  ;;  %v99_v15 = vpop.eup %98 }
 0x123   :  { %40 = vadd.xlane.f32.xlu1 %v39_v13  ;;  %v38_v17 = vmul.f32 %v99_v15, %v37_v16 }
 0x1b0   :  { %v41_v18 = vpop.xlane.xlu1 %40 }
 0x1b1   :  { %v42_v19 = vadd.f32 %v41_v18, %v38_v17 }
 0x1b3   :  { %44 = vst.msk [vmem:[#allocation3] sm:$0xff] %vm16_vm1, %v42_v19 }
 0x1ba   :  { %v49_v20 = vld [vmem:[#allocation3] sm:$0xff] }
 0x1bb   :  { %100 = vlog2.f32 %v49_v20 }
 0x1bc   :  { %102 = vrcp.f32 %v49_v20 }
 0x1c5   :  { %v101_v21 = vpop.eup %100 }
 0x1c6   :  { %v103_v22 = vpop.eup %102  ;;  %v52_v23 = vmul.f32 0.6931472, %v101_v21 }
 0x1c7   :  { %v57_v24 = vsub.f32 1.0, %v103_v22 }
 0x1c8   :  { %v53_v27 = vadd.f32 %v52_v23, %v50_v26 }
 0x1c9   :  { %v58_v25 = vmul.f32 0.2, %v57_v24 }
 0x1ca   :  { %v55_v31 = vsub.f32 %v53_v27, %v54_v29 }
 0x1cb   :  { %v59_v28 = vadd.f32 0.8, %v58_v25 }
 0x1cd   :  { %v60_v30 = vmax.f32 %v59_v28, 0.1 }
 0x1cf   :  { %v61_v32 = vmin.f32 %v60_v30, 1.0 }
 0x1d1   :  { %v62_v33 = vmul.f32 %v61_v32, %v55_v31 }
 0x1d3   :  { %v63_v34 = vsel %vm16_vm1, %v62_v33, 0.0 }
 0x1d4   :  { %64 = vadd.xlane.f32.xlu1 %v63_v34 }
 0x261   :  { %v65_v35 = vpop.xlane.xlu1 %64 }
 0x262   :  { %v66_v36 = vrot.slane %v65_v35, 4 }
 0x264   :  { %v67_v37 = vadd.f32 %v66_v36, %v65_v35 }
 0x266   :  { %v68_v38 = vrot.slane %v67_v37, 2 }
 0x268   :  { %v69_v39 = vadd.f32 %v68_v38, %v67_v37 }
 0x26a   :  { %v70_v40 = vrot.slane %v69_v39, 1 }
 0x26c   :  { %v71_v41 = vadd.f32 %v70_v40, %v69_v39 }
 0x26e   :  { %89 = vpush %v71_v41 }
 0x29f   :  { %s90_s14 = spop %89 }
 0x2a0   :  { %v73_v42 = vstv %s90_s14 }
 0x2a1   :  { %74 = vst [vmem:[#allocation4] sm:$0x1] %v73_v42 }
 0x2a2   :  { %115 = shalt.err (!%p112_p4)
}
 0x2a3   :  { %s116_s18 = scalar_lea.hbm %s174_s2, 16 }
 0x2a4   :  { %p117_p5 = scmp.ne.s32.totalorder %s174_s2, %s116_s18  ;;  %p120_p6 = scmp.lt.u32.totalorder %s116_s18, %s174_s2 }
 0x2a6   :  { %p122_p7 = pnand %p120_p6, %p117_p5 }
 0x2a8   :  { %125 = shalt.err (!%p122_p7)
}
 0x2a9   :  { %84 = dma.vmem_to_hbm [thread:$0]  %s82_s13, 16, %s174_s2, [#allocation5]  }
 0x2aa   :  { %126 = dma.done.wait [#allocation5], 16  }
 0x2ab   :  { %127 = vsyncadd [#allocation5], 4294967280 }
 0x2ac   :  { %88 = vsyncpa [#allocation5], 1 }

</bundles_post_ra>
